<compile_context>
chip_gen: v6e
topology: v6e:2x2x1
jax: 0.10.0
libtpu: 0.0.40
codegen_flags: <defaults>
</compile_context>

<pallas_src>
import jax
import jax.numpy as jnp
from jax.experimental import pallas as pl
from jax.experimental.pallas import tpu as pltpu


def _mlp_kernel(x_ref, w0_ref, b0_ref, w1_ref, b1_ref, w2_ref, b2_ref, o_ref):
    # Linear0 (+ bias); accumulate in f32 on the MXU.
    h = jnp.dot(x_ref[...], w0_ref[...], preferred_element_type=jnp.float32)
    h = h + b0_ref[...]

    # relu -> (BN0 folded into w1/b1) -> Linear1
    h = jnp.maximum(h, 0.0).astype(w1_ref.dtype)
    h = jnp.dot(h, w1_ref[...], preferred_element_type=jnp.float32)
    h = h + b1_ref[...]

    # relu -> (BN1 folded into w2/b2) -> Linear2
    h = jnp.maximum(h, 0.0).astype(w2_ref.dtype)
    h = jnp.dot(h, w2_ref[...], preferred_element_type=jnp.float32)
    h = h + b2_ref[...]

    o_ref[...] = h.astype(o_ref.dtype)


def _round_up(n, m):
    return ((n + m - 1) // m) * m


def prepare_params(p, *, lane=128, compute_dtype=jnp.float32,
                   pad_output_lanes=False):
    """Fold BN affines into the following Linear and zero-pad hidden feature
    dims to lane multiples so the intermediate matmuls are lane-dense."""
    w0, b0 = p["w0"], p["b0"]

    # y = (x*scale + shift) @ w + b  ==  x @ (scale^T * w) + (shift @ w + b)
    w1 = p["w1"] * p["scale0"].reshape(-1, 1)
    b1 = p["b1"] + p["shift0"] @ p["w1"]
    w2 = p["w2"] * p["scale1"].reshape(-1, 1)
    b2 = p["b2"] + p["shift1"] @ p["w2"]

    H0, H1, C_out = w0.shape[1], w1.shape[1], w2.shape[1]
    H0p, H1p = _round_up(H0, lane), _round_up(H1, lane)
    # Default: do NOT lane-pad the last layer output -- masked store but 16x
    # fewer writeback bytes for C_out=8 and no extra column-slice pass.
    Cp = _round_up(C_out, lane) if pad_output_lanes else C_out

    def pad_out(w, b, to):
        d = to - w.shape[1]
        return jnp.pad(w, ((0, 0), (0, d))), jnp.pad(b, ((0, 0), (0, d)))

    def pad_in(w, to):
        return jnp.pad(w, ((0, to - w.shape[0]), (0, 0)))

    w0, b0 = pad_out(w0, b0, H0p)
    w1, b1 = pad_out(pad_in(w1, H0p), b1, H1p)
    w2, b2 = pad_out(pad_in(w2, H1p), b2, Cp)

    cast = lambda w: w.astype(compute_dtype)
    return dict(
        w0=cast(w0), b0=b0.astype(jnp.float32),
        w1=cast(w1), b1=b1.astype(jnp.float32),
        w2=cast(w2), b2=b2.astype(jnp.float32),
        out_channels=C_out, compute_dtype=compute_dtype,
    )


def mlp_forward(x, prepared, *, tile_n=1024, out_dtype=jnp.float32,
                vmem_cap_bytes=40 << 20):
    """x: (N, in_channels). prepared: output of prepare_params."""
    N, C_in = x.shape
    w0, b0 = prepared["w0"], prepared["b0"]
    w1, b1 = prepared["w1"], prepared["b1"]
    w2, b2 = prepared["w2"], prepared["b2"]
    C_out = prepared["out_channels"]
    H0p, H1p, Wcols = w0.shape[1], w1.shape[1], w2.shape[1]

    compute_dtype = prepared["compute_dtype"]
    x = x.astype(compute_dtype)
    in_isz = jnp.dtype(compute_dtype).itemsize
    out_isz = jnp.dtype(out_dtype).itemsize

    # ---- tile_n selection --------------------------------------------------
    # Sublane tiling constraint: (8,128) for 32-bit, (16,128) for bf16.
    sublane = 16 if in_isz == 2 else 8
    Np8 = _round_up(N, sublane)
    tile_n = max(sublane, min(int(tile_n), Np8))
    tile_n = _round_up(tile_n, sublane)          # robust to arbitrary tile_n
    # v7x: ensure >= 2 grid steps (second TensorCore gets work) whenever the
    # batch is big enough that each half-tile is still >= 256 rows.
    if tile_n >= Np8 and Np8 >= 512:
        tile_n = _round_up((Np8 + 1) // 2, sublane)

    # Per-step VMEM estimate: double-buffered x/out tiles, single-buffered
    # weights/biases, f32 intermediates, plus margin for compiler scratch.
    def vmem_estimate(t):
        x_buf = 2 * t * C_in * in_isz
        o_buf = 2 * t * Wcols * out_isz
        w_buf = ((C_in * H0p + H0p * H1p + H1p * Wcols) * in_isz
                 + (H0p + H1p + Wcols) * 4)
        inter = 2 * t * (H0p + H1p) * 4
        return x_buf + o_buf + w_buf + inter + (2 << 20)

    # Shrink until the working set fits a per-chip-safe budget (covers v5e's
    # 16 MiB default scoped VMEM and v7x's 64 MiB physical VMEM).
    while tile_n > sublane and vmem_estimate(tile_n) > vmem_cap_bytes:
        tile_n = max(sublane, _round_up(tile_n // 2, sublane))

    # Pad the batch so every tile is full; non-divisible N never forces a
    # tiny trailing tile.
    Np = _round_up(N, tile_n)
    if Np != N:
        x = jnp.pad(x, ((0, Np - N), (0, 0)))

    # ---- specs ---------------------------------------------------------------
    def invariant(shape):
        # Grid-invariant operand: constant index_map, so a second pipeline
        # buffer is pure VMEM waste -> single-buffer it.
        return pl.BlockSpec(shape, lambda i: (0, 0),
                            pipeline_mode=pl.Buffered(1))

    grid_spec = pltpu.PrefetchScalarGridSpec(
        num_scalar_prefetch=0,
        grid=(Np // tile_n,),
        in_specs=[
            pl.BlockSpec((tile_n, C_in), lambda i: (i, 0)),     # x tile
            invariant((C_in, H0p)), invariant((1, H0p)),        # Linear0
            invariant((H0p, H1p)),  invariant((1, H1p)),        # BN0-folded Linear1
            invariant((H1p, Wcols)), invariant((1, Wcols)),     # BN1-folded Linear2
        ],
        out_specs=pl.BlockSpec((tile_n, Wcols), lambda i: (i, 0)),
    )

    # Advisory cost hint so XLA schedules producers / the final row-slice
    # around the custom call.
    param_bytes = sum(int(a.size) * a.dtype.itemsize
                      for a in (w0, b0, w1, b1, w2, b2))
    cost = pl.CostEstimate(
        flops=2 * Np * (C_in * H0p + H0p * H1p + H1p * Wcols),
        transcendentals=0,
        bytes_accessed=int(x.size) * in_isz + param_bytes + Np * Wcols * out_isz,
    )

    vmem_limit = int(min(max(2 * vmem_estimate(tile_n), 32 << 20), 48 << 20))

    out = pl.pallas_call(
        _mlp_kernel,
        grid_spec=grid_spec,
        out_shape=jax.ShapeDtypeStruct((Np, Wcols), out_dtype),
        compiler_params=pltpu.CompilerParams(
            dimension_semantics=("parallel",),
            vmem_limit_bytes=vmem_limit),
        cost_estimate=cost,
    )(x, w0, b0, w1, b1, w2, b2)

    # Strip batch padding (and lane padding if the output was lane-padded).
    return out[:N, :C_out]


def make_params(key, in_channels, hid_layers, out_channels, eps=1e-5):
    """Deterministic synthetic parameters matching PyTorch MLP.__init__ shapes.
    Linear weights stored pre-transposed as (in_features, out_features)."""
    H0, H1 = hid_layers
    ks = jax.random.split(key, 10)

    def lin(kw, kb, fan_in, fan_out):
        w = jax.random.normal(kw, (fan_in, fan_out), jnp.float32) * 0.1
        b = jax.random.normal(kb, (1, fan_out), jnp.float32) * 0.1
        return w, b

    w0, b0 = lin(ks[0], ks[1], in_channels, H0)
    w1, b1 = lin(ks[2], ks[3], H0, H1)
    w2, b2 = lin(ks[4], ks[5], H1, out_channels)

    # BatchNorm1d (eval mode) folded to affine: y = x*scale + shift.
    def bn(kg, kb2, dim):
        gamma = 1.0 + 0.05 * jax.random.normal(kg, (1, dim), jnp.float32)
        beta = 0.05 * jax.random.normal(kb2, (1, dim), jnp.float32)
        running_mean = jnp.zeros((1, dim), jnp.float32)
        running_var = jnp.ones((1, dim), jnp.float32)
        scale = gamma / jnp.sqrt(running_var + eps)
        shift = beta - running_mean * scale
        return scale, shift

    scale0, shift0 = bn(ks[6], ks[7], H0)
    scale1, shift1 = bn(ks[8], ks[9], H1)

    return dict(w0=w0, b0=b0, scale0=scale0, shift0=shift0,
                w1=w1, b1=b1, scale1=scale1, shift1=shift1,
                w2=w2, b2=b2)


def mlp_reference(x, p):
    h = x @ p["w0"] + p["b0"]
    h = jnp.maximum(h, 0.0)
    h = h * p["scale0"] + p["shift0"]
    h = h @ p["w1"] + p["b1"]
    h = jnp.maximum(h, 0.0)
    h = h * p["scale1"] + p["shift1"]
    return h @ p["w2"] + p["b2"]


if __name__ == "__main__":
    key = jax.random.PRNGKey(0)
    k_x, k_p, k_x2 = jax.random.split(key, 3)

    N, in_channels = 100, 16          # N deliberately not tile-divisible
    hid_layers = [32, 48]
    out_channels = 8

    x = jax.random.normal(k_x, (N, in_channels), jnp.float32)
    params = make_params(k_p, in_channels, hid_layers, out_channels)
    ref = mlp_reference(x, params)

    # f32 path, default large tile (single grid step at this size).
    prepared = prepare_params(params)
    out = jax.block_until_ready(mlp_forward(x, prepared))
    assert out.shape == (N, out_channels)
    assert jnp.allclose(out, ref, atol=1e-4, rtol=1e-4), "mismatch vs reference"

    # Multi-tile grid + batch padding + odd tile_n rounding (50 -> 56).
    out_tiled = jax.block_until_ready(mlp_forward(x, prepared, tile_n=50))
    assert jnp.allclose(out_tiled, ref, atol=1e-4, rtol=1e-4), "mismatch (tiled)"

    # Larger batch: exercises the >=2-grid-step split (keeps both v7x TCs busy).
    N2 = 640
    x2 = jax.random.normal(k_x2, (N2, in_channels), jnp.float32)
    ref2 = mlp_reference(x2, params)
    out2 = jax.block_until_ready(mlp_forward(x2, prepared))
    assert out2.shape == (N2, out_channels)
    assert jnp.allclose(out2, ref2, atol=1e-4, rtol=1e-4), "mismatch (split grid)"

    # bf16 operands + bf16 output (~2x MXU rate and ~half the HBM traffic on
    # v6e/v7x); accumulation stays f32 on the MXU, so only a loosened
    # tolerance is needed.
    prepared_bf16 = prepare_params(params, compute_dtype=jnp.bfloat16)
    out_bf16 = jax.block_until_ready(
        mlp_forward(x, prepared_bf16, out_dtype=jnp.bfloat16))
    assert out_bf16.shape == (N, out_channels)
    assert jnp.allclose(out_bf16.astype(jnp.float32), ref,
                        atol=1e-1, rtol=1e-1), "mismatch (bf16)"

    print("KERNEL_OK")
</pallas_src>

<mosaic_0001>
module attributes {stable_mosaic.version = 11 : i64} {
  func.func @_mlp_kernel(%arg0: i32, %arg1: memref<104x16xf32, #tpu.memory_space<vmem>>, %arg2: memref<16x128xf32, #tpu.memory_space<vmem>>, %arg3: memref<1x128xf32, #tpu.memory_space<vmem>>, %arg4: memref<128x128xf32, #tpu.memory_space<vmem>>, %arg5: memref<1x128xf32, #tpu.memory_space<vmem>>, %arg6: memref<128x8xf32, #tpu.memory_space<vmem>>, %arg7: memref<1x8xf32, #tpu.memory_space<vmem>>, %arg8: memref<104x8xf32, #tpu.memory_space<vmem>>) attributes {dimension_semantics = [#tpu.dimension_semantics<parallel>], iteration_bounds = array<i64: 1>, scalar_prefetch = 0 : i64, scratch_operands = 0 : i64, tpu.core_type = #tpu.core_type<tc>, window_params = [{transform_indices = @transform_0, window_bounds = array<i64: 104, 16>}, {pipeline_mode = #tpu.pipeline_mode<synchronous>, transform_indices = @transform_1, window_bounds = array<i64: 16, 128>}, {pipeline_mode = #tpu.pipeline_mode<synchronous>, transform_indices = @transform_2, window_bounds = array<i64: 1, 128>}, {pipeline_mode = #tpu.pipeline_mode<synchronous>, transform_indices = @transform_3, window_bounds = array<i64: 128, 128>}, {pipeline_mode = #tpu.pipeline_mode<synchronous>, transform_indices = @transform_4, window_bounds = array<i64: 1, 128>}, {pipeline_mode = #tpu.pipeline_mode<synchronous>, transform_indices = @transform_5, window_bounds = array<i64: 128, 8>}, {pipeline_mode = #tpu.pipeline_mode<synchronous>, transform_indices = @transform_6, window_bounds = array<i64: 1, 8>}, {transform_indices = @transform_7, window_bounds = array<i64: 104, 8>}]} {
    %c0 = arith.constant 0 : index
    %c0_0 = arith.constant 0 : index
    %0 = vector.load %arg1[%c0, %c0_0] : memref<104x16xf32, #tpu.memory_space<vmem>>, vector<104x16xf32>
    %c0_1 = arith.constant 0 : index
    %c0_2 = arith.constant 0 : index
    %1 = vector.load %arg2[%c0_1, %c0_2] : memref<16x128xf32, #tpu.memory_space<vmem>>, vector<16x128xf32>
    %cst = arith.constant dense<0.000000e+00> : vector<104x128xf32>
    %2 = tpu.matmul %0, %1, %cst {dimension_numbers = #tpu.dot_dimension_numbers<[1], [0], [0], [1], [0, 0, 1, 1], [], []>} : vector<104x16xf32>, vector<16x128xf32>, vector<104x128xf32> -> vector<104x128xf32>
    %c0_3 = arith.constant 0 : index
    %c0_4 = arith.constant 0 : index
    %3 = vector.load %arg3[%c0_3, %c0_4] : memref<1x128xf32, #tpu.memory_space<vmem>>, vector<1x128xf32>
    %4 = vector.broadcast %3 : vector<1x128xf32> to vector<104x128xf32>
    %5 = arith.addf %2, %4 : vector<104x128xf32>
    %cst_5 = arith.constant 0.000000e+00 : f32
    %6 = vector.broadcast %cst_5 : f32 to vector<104x128xf32>
    %7 = arith.maximumf %5, %6 : vector<104x128xf32>
    %c0_6 = arith.constant 0 : index
    %c0_7 = arith.constant 0 : index
    %8 = vector.load %arg4[%c0_6, %c0_7] : memref<128x128xf32, #tpu.memory_space<vmem>>, vector<128x128xf32>
    %cst_8 = arith.constant dense<0.000000e+00> : vector<104x128xf32>
    %9 = tpu.matmul %7, %8, %cst_8 {dimension_numbers = #tpu.dot_dimension_numbers<[1], [0], [0], [1], [0, 0, 1, 1], [], []>} : vector<104x128xf32>, vector<128x128xf32>, vector<104x128xf32> -> vector<104x128xf32>
    %c0_9 = arith.constant 0 : index
    %c0_10 = arith.constant 0 : index
    %10 = vector.load %arg5[%c0_9, %c0_10] : memref<1x128xf32, #tpu.memory_space<vmem>>, vector<1x128xf32>
    %11 = vector.broadcast %10 : vector<1x128xf32> to vector<104x128xf32>
    %12 = arith.addf %9, %11 : vector<104x128xf32>
    %cst_11 = arith.constant 0.000000e+00 : f32
    %13 = vector.broadcast %cst_11 : f32 to vector<104x128xf32>
    %14 = arith.maximumf %12, %13 : vector<104x128xf32>
    %c0_12 = arith.constant 0 : index
    %c0_13 = arith.constant 0 : index
    %15 = vector.load %arg6[%c0_12, %c0_13] : memref<128x8xf32, #tpu.memory_space<vmem>>, vector<128x8xf32>
    %cst_14 = arith.constant dense<0.000000e+00> : vector<104x8xf32>
    %16 = tpu.matmul %14, %15, %cst_14 {dimension_numbers = #tpu.dot_dimension_numbers<[1], [0], [0], [1], [0, 0, 1, 1], [], []>} : vector<104x128xf32>, vector<128x8xf32>, vector<104x8xf32> -> vector<104x8xf32>
    %c0_15 = arith.constant 0 : index
    %c0_16 = arith.constant 0 : index
    %17 = vector.load %arg7[%c0_15, %c0_16] : memref<1x8xf32, #tpu.memory_space<vmem>>, vector<1x8xf32>
    %18 = vector.broadcast %17 : vector<1x8xf32> to vector<104x8xf32>
    %19 = arith.addf %16, %18 : vector<104x8xf32>
    %c0_17 = arith.constant 0 : index
    %c0_18 = arith.constant 0 : index
    %20 = vector.load %arg8[%c0_17, %c0_18] : memref<104x8xf32, #tpu.memory_space<vmem>>, vector<104x8xf32>
    tpu.vector_store %arg8[%c0_17, %c0_18], %19 {strides = array<i32>} : memref<104x8xf32, #tpu.memory_space<vmem>>, vector<104x8xf32>,
    return
  }
  func.func @transform_0(%arg0: i32) -> (i32, i32) {
    %c0_i32 = arith.constant 0 : i32
    %c0_i32_0 = arith.constant 0 : i32
    return %arg0, %c0_i32 : i32, i32
  }
  func.func @transform_1(%arg0: i32) -> (i32, i32) {
    %c0_i32 = arith.constant 0 : i32
    %c0_i32_0 = arith.constant 0 : i32
    %c0_i32_1 = arith.constant 0 : i32
    return %c0_i32, %c0_i32_0 : i32, i32
  }
  func.func @transform_2(%arg0: i32) -> (i32, i32) {
    %c0_i32 = arith.constant 0 : i32
    %c0_i32_0 = arith.constant 0 : i32
    %c0_i32_1 = arith.constant 0 : i32
    return %c0_i32, %c0_i32_0 : i32, i32
  }
  func.func @transform_3(%arg0: i32) -> (i32, i32) {
    %c0_i32 = arith.constant 0 : i32
    %c0_i32_0 = arith.constant 0 : i32
    %c0_i32_1 = arith.constant 0 : i32
    return %c0_i32, %c0_i32_0 : i32, i32
  }
  func.func @transform_4(%arg0: i32) -> (i32, i32) {
    %c0_i32 = arith.constant 0 : i32
    %c0_i32_0 = arith.constant 0 : i32
    %c0_i32_1 = arith.constant 0 : i32
    return %c0_i32, %c0_i32_0 : i32, i32
  }
  func.func @transform_5(%arg0: i32) -> (i32, i32) {
    %c0_i32 = arith.constant 0 : i32
    %c0_i32_0 = arith.constant 0 : i32
    %c0_i32_1 = arith.constant 0 : i32
    return %c0_i32, %c0_i32_0 : i32, i32
  }
  func.func @transform_6(%arg0: i32) -> (i32, i32) {
    %c0_i32 = arith.constant 0 : i32
    %c0_i32_0 = arith.constant 0 : i32
    %c0_i32_1 = arith.constant 0 : i32
    return %c0_i32, %c0_i32_0 : i32, i32
  }
  func.func @transform_7(%arg0: i32) -> (i32, i32) {
    %c0_i32 = arith.constant 0 : i32
    %c0_i32_0 = arith.constant 0 : i32
    return %arg0, %c0_i32 : i32, i32
  }
}

</mosaic_0001>

<bundles_post_ra>
// kernel: tpu_custom_call.1
= control target key start
LH: loop header
LB: loop body
LE: loop exit
PB: predicated region body
PF: predicated region fallthrough
CT: control target
= control target key end

     0   :  { %v848_v0 = vmov 0.0   ;;  %vm849_vm0 = vmmov 0   ;;  %vm48_vm1 = vcmask 130048   ;;  %vm550_vm2 = vcmask 64512   ;;  %s1249_s1 = inlined_call_operand.vmem [shape: f32[16,128], index: 1, kind: input, shape index: {}]   ;;  %s1250_s0 = inlined_call_operand.vmem [shape: f32[104,16], index: 0, kind: input, shape index: {}]   ;;  %s1251_s3 = inlined_call_operand.vmem [shape: f32[128,128], index: 3, kind: input, shape index: {}]   ;;  %s1252_s5 = inlined_call_operand.vmem [shape: f32[128,8], index: 5, kind: input, shape index: {}]   ;;  %s1253_s2 = inlined_call_operand.vmem [shape: f32[1,128], index: 2, kind: input, shape index: {}]   ;;  %s1254_s4 = inlined_call_operand.vmem [shape: f32[1,128], index: 4, kind: input, shape index: {}]   ;;  %s1255_s6 = inlined_call_operand.vmem [shape: f32[1,8], index: 6, kind: input, shape index: {}]   ;;  %s1256_s7 = inlined_call_operand.vmem [shape: f32[104,8], index: 7, kind: output, shape index: {}]  }
   0x1   :  { %657 = vmatprep.subr.mxu0 %v848_v0  ;;  %v40_v1 = vld [vmem:[%s1249_s1 + $0x8] sm:$0xff]  ;;  %v39_v2 = vld [vmem:[%s1249_s1] sm:$0xff]  ;;  %661 = vmatprep.mubr.msk.f32.mxu0 %vm849_vm0, %v848_v0  ;;  %v246_v6 = vld [vmem:[%s1251_s3 + $0x78] sm:$0xff] }
   0x2   :  { %658 = vmatpush3.msra.mxu0 %v40_v1  ;;  %v26_v3 = vld [vmem:[%s1250_s0] sm:$0xff]  ;;  %842 = vmatprep.subr.mxu1 %v848_v0  ;;  %v27_v5 = vld [vmem:[%s1250_s0 + $0x8] sm:$0xff]  ;;  %v245_v7 = vld [vmem:[%s1251_s3 + $0x70] sm:$0xff] }
   0x3   :  { %659 = vmatprep.subr.mxu0 %v848_v0  ;;  %844 = vmatpush3.msra.mxu1 %v40_v1  ;;  %v34_v4 = vld [vmem:[%s1250_s0 + $0x40] sm:$0xff]  ;;  %v35_v8 = vld [vmem:[%s1250_s0 + $0x48] sm:$0xff]  ;;  %v28_v10 = vld [vmem:[%s1250_s0 + $0x10] sm:$0xff] }
   0x4   :  { %660 = vmatpush3.msra.mxu0 %v39_v2  ;;  %843 = vmatprep.subr.mxu1 %v848_v0  ;;  %v244_v9 = vld [vmem:[%s1251_s3 + $0x68] sm:$0xff]  ;;  %v243_v11 = vld [vmem:[%s1251_s3 + $0x60] sm:$0xff]  ;;  %v36_v12 = vld [vmem:[%s1250_s0 + $0x50] sm:$0xff] }
   0x5   :  { %662 = vmatmul.mubr.msk.f32.vlgmr.msra.gmra.mxu0 %vm48_vm1, %v26_v3  ;;  %845 = vmatpush3.msra.mxu1 %v39_v2  ;;  %v242_v13 = vld [vmem:[%s1251_s3 + $0x58] sm:$0xff]  ;;  %v241_v15 = vld [vmem:[%s1251_s3 + $0x50] sm:$0xff]  ;;  %v240_v17 = vld [vmem:[%s1251_s3 + $0x48] sm:$0xff] }
   0x6   :  { %664 = vmatprep.mubr.msk.f32.mxu0 %vm849_vm0, %v848_v0  ;;  %685 = vmatprep.mubr.msk.f32.mxu1 %vm849_vm0, %v848_v0  ;;  %v29_v14 = vld [vmem:[%s1250_s0 + $0x18] sm:$0xff]  ;;  %v30_v18 = vld [vmem:[%s1250_s0 + $0x20] sm:$0xff]  ;;  %v31_v22 = vld [vmem:[%s1250_s0 + $0x28] sm:$0xff] }
   0x7   :  { %686 = vmatmul.mubr.msk.f32.vlgmr.msra.gmra.mxu1 %vm48_vm1, %v34_v4  ;;  %700 = vmatprep.subr.mxu1 %v848_v0  ;;  %v37_v16 = vld [vmem:[%s1250_s0 + $0x58] sm:$0xff]  ;;  %v239_v19 = vld [vmem:[%s1251_s3 + $0x40] sm:$0xff]  ;;  %v237_v23 = vld [vmem:[%s1251_s3 + $0x30] sm:$0xff] }
   0x8   :  { %688 = vmatprep.mubr.msk.f32.mxu1 %vm849_vm0, %v848_v0  ;;  %701 = vmatpush3.msra.mxu1 %v246_v6  ;;  %v38_v20 = vld [vmem:[%s1250_s0 + $0x60] sm:$0xff]  ;;  %v238_v21 = vld [vmem:[%s1251_s3 + $0x38] sm:$0xff]  ;;  %v236_v24 = vld [vmem:[%s1251_s3 + $0x28] sm:$0xff] }
   0x9   :  { %665 = vmatmul.mubr.msk.f32.gmra.mxu0 %vm48_vm1, %v27_v5  ;;  %702 = vmatprep.subr.mxu1 %v848_v0  ;;  %v32_v25 = vld [vmem:[%s1250_s0 + $0x30] sm:$0xff]  ;;  %v235_v26 = vld [vmem:[%s1251_s3 + $0x20] sm:$0xff]  ;;  %v234_v27 = vld [vmem:[%s1251_s3 + $0x18] sm:$0xff] }
   0xa   :  { %667 = vmatprep.mubr.msk.f32.mxu0 %vm849_vm0, %v848_v0  ;;  %703 = vmatpush3.msra.mxu1 %v245_v7  ;;  %v33_v28 = vld [vmem:[%s1250_s0 + $0x38] sm:$0xff]  ;;  %v233_v29 = vld [vmem:[%s1251_s3 + $0x10] sm:$0xff]  ;;  %v232_v30 = vld [vmem:[%s1251_s3 + $0x8] sm:$0xff] }
   0xb   :  { %689 = vmatmul.mubr.msk.f32.gmra.mxu1 %vm48_vm1, %v35_v8  ;;  %704 = vmatprep.subr.mxu1 %v848_v0  ;;  %v231_v31 = vld [vmem:[%s1251_s3] sm:$0xff]  ;;  %v412_v32 = vld [vmem:[%s1252_s5 + $0x78] sm:$0xff]  ;;  %v411_v33 = vld [vmem:[%s1252_s5 + $0x70] sm:$0xff] }
   0xc   :  { %691 = vmatprep.mubr.msk.f32.mxu1 %vm849_vm0, %v848_v0  ;;  %705 = vmatpush3.msra.mxu1 %v244_v9  ;;  %v410_v34 = vld [vmem:[%s1252_s5 + $0x68] sm:$0xff]  ;;  %v409_v35 = vld [vmem:[%s1252_s5 + $0x60] sm:$0xff]  ;;  %v408_v36 = vld [vmem:[%s1252_s5 + $0x58] sm:$0xff] }
   0xd   :  { %668 = vmatmul.mubr.msk.f32.gmra.mxu0 %vm48_vm1, %v28_v10  ;;  %706 = vmatprep.subr.mxu1 %v848_v0  ;;  %v407_v37 = vld [vmem:[%s1252_s5 + $0x50] sm:$0xff]  ;;  %v406_v38 = vld [vmem:[%s1252_s5 + $0x48] sm:$0xff]  ;;  %v405_v39 = vld [vmem:[%s1252_s5 + $0x40] sm:$0xff] }
   0xe   :  { %670 = vmatprep.mubr.msk.f32.mxu0 %vm849_vm0, %v848_v0  ;;  %707 = vmatpush3.msra.mxu1 %v243_v11  ;;  %v404_v40 = vld [vmem:[%s1252_s5 + $0x38] sm:$0xff]  ;;  %v403_v41 = vld [vmem:[%s1252_s5 + $0x30] sm:$0xff]  ;;  %v402_v42 = vld [vmem:[%s1252_s5 + $0x28] sm:$0xff] }
   0xf   :  { %692 = vmatmul.mubr.msk.f32.gmra.mxu1 %vm48_vm1, %v36_v12  ;;  %708 = vmatprep.subr.mxu1 %v848_v0  ;;  %v401_v43 = vld [vmem:[%s1252_s5 + $0x20] sm:$0xff]  ;;  %v400_v44 = vld [vmem:[%s1252_s5 + $0x18] sm:$0xff]  ;;  %v399_v45 = vld [vmem:[%s1252_s5 + $0x10] sm:$0xff] }
  0x10   :  { %694 = vmatprep.mubr.msk.f32.mxu1 %vm849_vm0, %v848_v0  ;;  %709 = vmatpush3.msra.mxu1 %v242_v13  ;;  %v1106_v46 = vld [vmem:[%s1253_s2] ss:$0 sm:$0xff] }
  0x11   :  { %671 = vmatmul.mubr.msk.f32.gmra.mxu0 %vm48_vm1, %v29_v14  ;;  %710 = vmatprep.subr.mxu1 %v848_v0 }
  0x12   :  { %673 = vmatprep.mubr.msk.f32.mxu0 %vm849_vm0, %v848_v0  ;;  %711 = vmatpush3.msra.mxu1 %v241_v15 }
  0x13   :  { %695 = vmatmul.mubr.msk.f32.gmra.mxu1 %vm48_vm1, %v37_v16  ;;  %712 = vmatprep.subr.mxu1 %v848_v0 }
  0x14   :  { %697 = vmatprep.mubr.msk.f32.mxu1 %vm849_vm0, %v848_v0  ;;  %713 = vmatpush3.msra.mxu1 %v240_v17 }
  0x15   :  { %674 = vmatmul.mubr.msk.f32.gmra.mxu0 %vm48_vm1, %v30_v18  ;;  %714 = vmatprep.subr.mxu1 %v848_v0 }
  0x16   :  { %676 = vmatprep.mubr.msk.f32.mxu0 %vm849_vm0, %v848_v0  ;;  %715 = vmatpush3.msra.mxu1 %v239_v19 }
  0x17   :  { %698 = vmatmul.mubr.msk.f32.gmra.mxu1 %vm48_vm1, %v38_v20  ;;  %716 = vmatprep.subr.mxu1 %v848_v0 }
  0x18   :  { %717 = vmatpush3.msra.mxu1 %v238_v21  ;;  %732 = vmatprep.mubr.msk.f32.mxu1 %vm849_vm0, %v848_v0 }
  0x19   :  { %677 = vmatmul.mubr.msk.f32.gmra.mxu0 %vm48_vm1, %v31_v22  ;;  %718 = vmatprep.subr.mxu1 %v848_v0 }
  0x1a   :  { %679 = vmatprep.mubr.msk.f32.mxu0 %vm849_vm0, %v848_v0  ;;  %719 = vmatpush3.msra.mxu1 %v237_v23 }
  0x1b   :  { %720 = vmatprep.subr.mxu1 %v848_v0  ;;  %771 = vmatprep.subr.mxu0 %v848_v0 }
  0x1c   :  { %721 = vmatpush3.msra.mxu1 %v236_v24  ;;  %772 = vmatpush3.msra.mxu0 %v412_v32 }
  0x1d   :  { %680 = vmatmul.mubr.msk.f32.gmra.mxu0 %vm48_vm1, %v32_v25  ;;  %722 = vmatprep.subr.mxu1 %v848_v0 }
  0x1e   :  { %682 = vmatprep.mubr.msk.f32.mxu0 %vm849_vm0, %v848_v0  ;;  %723 = vmatpush3.msra.mxu1 %v235_v26 }
  0x1f   :  { %724 = vmatprep.subr.mxu1 %v848_v0  ;;  %773 = vmatprep.subr.mxu0 %v848_v0 }
  0x20   :  { %725 = vmatpush3.msra.mxu1 %v234_v27  ;;  %774 = vmatpush3.msra.mxu0 %v411_v33 }
  0x21   :  { %683 = vmatmul.mubr.msk.f32.gmra.mxu0 %vm48_vm1, %v33_v28  ;;  %726 = vmatprep.subr.mxu1 %v848_v0 }
  0x22   :  { %803 = vmatprep.mubr.msk.f32.mxu0 %vm849_vm0, %v848_v0  ;;  %727 = vmatpush3.msra.mxu1 %v233_v29 }
  0x23   :  { %728 = vmatprep.subr.mxu1 %v848_v0  ;;  %775 = vmatprep.subr.mxu0 %v848_v0 }
  0x24   :  { %729 = vmatpush3.msra.mxu1 %v232_v30  ;;  %776 = vmatpush3.msra.mxu0 %v410_v34 }
  0x25   :  { %730 = vmatprep.subr.mxu1 %v848_v0  ;;  %777 = vmatprep.subr.mxu0 %v848_v0 }
  0x26   :  { %731 = vmatpush3.msra.mxu1 %v231_v31  ;;  %778 = vmatpush3.msra.mxu0 %v409_v35 }
  0x27   :  { %779 = vmatprep.subr.mxu0 %v848_v0 }
  0x28   :  { %780 = vmatpush3.msra.mxu0 %v408_v36  ;;  %v398_v36 = vld [vmem:[%s1252_s5 + $0x8] sm:$0xff] }
  0x29   :  { %781 = vmatprep.subr.mxu0 %v848_v0 }
  0x2a   :  { %782 = vmatpush3.msra.mxu0 %v407_v37  ;;  %v397_v37 = vld [vmem:[%s1252_s5] sm:$0xff] }
  0x2b   :  { %783 = vmatprep.subr.mxu0 %v848_v0 }
  0x2c   :  { %784 = vmatpush3.msra.mxu0 %v406_v38  ;;  %v1155_v38 = vld [vmem:[%s1254_s4] ss:$0 sm:$0xff] }
  0x2d   :  { %785 = vmatprep.subr.mxu0 %v848_v0 }
  0x2e   :  { %786 = vmatpush3.msra.mxu0 %v405_v39 }
  0x2f   :  { %787 = vmatprep.subr.mxu0 %v848_v0 }
  0x30   :  { %788 = vmatpush3.msra.mxu0 %v404_v40 }
  0x31   :  { %789 = vmatprep.subr.mxu0 %v848_v0 }
  0x32   :  { %790 = vmatpush3.msra.mxu0 %v403_v41 }
  0x33   :  { %791 = vmatprep.subr.mxu0 %v848_v0 }
  0x34   :  { %792 = vmatpush3.msra.mxu0 %v402_v42 }
  0x35   :  { %793 = vmatprep.subr.mxu0 %v848_v0 }
  0x36   :  { %794 = vmatpush3.msra.mxu0 %v401_v43 }
  0x37   :  { %795 = vmatprep.subr.mxu0 %v848_v0 }
  0x38   :  { %796 = vmatpush3.msra.mxu0 %v400_v44 }
  0x39   :  { %797 = vmatprep.subr.mxu0 %v848_v0 }
  0x3a   :  { %798 = vmatpush3.msra.mxu0 %v399_v45 }
  0x3b   :  { %799 = vmatprep.subr.mxu0 %v848_v0 }
  0x3c   :  { %800 = vmatpush3.msra.mxu0 %v398_v36 }
  0x3d   :  { %801 = vmatprep.subr.mxu0 %v848_v0 }
  0x3e   :  { %802 = vmatpush3.msra.mxu0 %v397_v37 }
  0xc5   :  { %v154_v47 = vpop.f32.mrf.mxu0 }
  0xc6   :  { %v155_v48 = vadd.f32 %v1106_v46, %v154_v47 }
  0xc7   :  { %v663_v49 = vpop.f32.mrf.mxu0  ;;  %v194_v50 = vpop.f32.mrf.mxu1 }
  0xc8   :  { %v218_v51 = vmax.f32 %v155_v48, 0.0  ;;  %v195_v24 = vadd.f32 %v1106_v46, %v194_v50 }
  0xc9   :  { %v159_v52 = vpop.f32.mrf.mxu0  ;;  %v687_v53 = vpop.f32.mrf.mxu1 }
  0xca   :  { %v160_v54 = vadd.f32 %v1106_v46, %v159_v52  ;;  %733 = vmatmul.mubr.f32.vlgmr.msra.gmra.mxu1 %v218_v51  ;;  %v226_v27 = vmax.f32 %v195_v24, 0.0 }
  0xcb   :  { %v666_v55 = vpop.f32.mrf.mxu0  ;;  %735 = vmatprep.mubr.msk.f32.mxu1 %vm849_vm0, %v848_v0  ;;  %v199_v56 = vpop.f32.mrf.mxu1 }
  0xcc   :  { %v219_v57 = vmax.f32 %v160_v54, 0.0  ;;  %v200_v28 = vadd.f32 %v1106_v46, %v199_v56 }
  0xcd   :  { %v164_v58 = vpop.f32.mrf.mxu0  ;;  %v690_v59 = vpop.f32.mrf.mxu1 }
  0xce   :  { %v165_v60 = vadd.f32 %v1106_v46, %v164_v58  ;;  %736 = vmatmul.mubr.f32.gmra.mxu1 %v219_v57  ;;  %v227_v29 = vmax.f32 %v200_v28, 0.0  ;;  %v583_v28 = vld [vmem:[%s1255_s6] ss:$0 sm:$0xff] }
  0xcf   :  { %v669_v61 = vpop.f32.mrf.mxu0  ;;  %738 = vmatprep.mubr.msk.f32.mxu1 %vm849_vm0, %v848_v0  ;;  %v204_v62 = vpop.f32.mrf.mxu1 }
  0xd0   :  { %v220_v63 = vmax.f32 %v165_v60, 0.0  ;;  %v205_v30 = vadd.f32 %v1106_v46, %v204_v62 }
  0xd1   :  { %v169_v1 = vpop.f32.mrf.mxu0  ;;  %v693_v2 = vpop.f32.mrf.mxu1 }
  0xd2   :  { %v170_v3 = vadd.f32 %v1106_v46, %v169_v1  ;;  %739 = vmatmul.mubr.f32.gmra.mxu1 %v220_v63  ;;  %v228_v31 = vmax.f32 %v205_v30, 0.0 }
  0xd3   :  { %v672_v4 = vpop.f32.mrf.mxu0  ;;  %741 = vmatprep.mubr.msk.f32.mxu1 %vm849_vm0, %v848_v0  ;;  %v209_v5 = vpop.f32.mrf.mxu1 }
  0xd4   :  { %v221_v6 = vmax.f32 %v170_v3, 0.0  ;;  %v210_v32 = vadd.f32 %v1106_v46, %v209_v5 }
  0xd5   :  { %v174_v7 = vpop.f32.mrf.mxu0  ;;  %v696_v8 = vpop.f32.mrf.mxu1 }
  0xd6   :  { %v175_v9 = vadd.f32 %v1106_v46, %v174_v7  ;;  %742 = vmatmul.mubr.f32.gmra.mxu1 %v221_v6  ;;  %v229_v33 = vmax.f32 %v210_v32, 0.0 }
  0xd7   :  { %v675_v10 = vpop.f32.mrf.mxu0  ;;  %744 = vmatprep.mubr.msk.f32.mxu1 %vm849_vm0, %v848_v0  ;;  %v214_v11 = vpop.f32.mrf.mxu1 }
  0xd8   :  { %v222_v12 = vmax.f32 %v175_v9, 0.0  ;;  %v215_v34 = vadd.f32 %v1106_v46, %v214_v11 }
  0xd9   :  { %v179_v13 = vpop.f32.mrf.mxu0  ;;  %v699_v14 = vpop.f32.mrf.mxu1 }
  0xda   :  { %v180_v15 = vadd.f32 %v1106_v46, %v179_v13  ;;  %745 = vmatmul.mubr.f32.gmra.mxu1 %v222_v12  ;;  %v230_v35 = vmax.f32 %v215_v34, 0.0 }
  0xdb   :  { %v678_v16 = vpop.f32.mrf.mxu0  ;;  %747 = vmatprep.mubr.msk.f32.mxu1 %vm849_vm0, %v848_v0 }
  0xdc   :  { %v223_v17 = vmax.f32 %v180_v15, 0.0 }
  0xdd   :  { %v184_v18 = vpop.f32.mrf.mxu0 }
  0xde   :  { %v185_v19 = vadd.f32 %v1106_v46, %v184_v18  ;;  %748 = vmatmul.mubr.f32.gmra.mxu1 %v223_v17 }
  0xdf   :  { %v681_v20 = vpop.f32.mrf.mxu0  ;;  %750 = vmatprep.mubr.msk.f32.mxu1 %vm849_vm0, %v848_v0 }
  0xe0   :  { %v224_v21 = vmax.f32 %v185_v19, 0.0 }
  0xe1   :  { %v189_v22 = vpop.f32.mrf.mxu0 }
  0xe2   :  { %v190_v23 = vadd.f32 %v1106_v46, %v189_v22  ;;  %751 = vmatmul.mubr.f32.gmra.mxu1 %v224_v21 }
  0xe3   :  { %v684_v25 = vpop.f32.mrf.mxu0  ;;  %753 = vmatprep.mubr.msk.f32.mxu1 %vm849_vm0, %v848_v0 }
  0xe4   :  { %v225_v26 = vmax.f32 %v190_v23, 0.0 }
  0xe6   :  { %754 = vmatmul.mubr.f32.gmra.mxu1 %v225_v26 }
  0xe7   :  { %756 = vmatprep.mubr.msk.f32.mxu1 %vm849_vm0, %v848_v0 }
  0xea   :  { %757 = vmatmul.mubr.f32.gmra.mxu1 %v226_v27 }
  0xeb   :  { %759 = vmatprep.mubr.msk.f32.mxu1 %vm849_vm0, %v848_v0 }
  0xee   :  { %760 = vmatmul.mubr.f32.gmra.mxu1 %v227_v29 }
  0xef   :  { %762 = vmatprep.mubr.msk.f32.mxu1 %vm849_vm0, %v848_v0 }
  0xf2   :  { %763 = vmatmul.mubr.f32.gmra.mxu1 %v228_v31 }
  0xf3   :  { %765 = vmatprep.mubr.msk.f32.mxu1 %vm849_vm0, %v848_v0 }
  0xf6   :  { %766 = vmatmul.mubr.f32.gmra.mxu1 %v229_v33 }
  0xf7   :  { %768 = vmatprep.mubr.msk.f32.mxu1 %vm849_vm0, %v848_v0 }
  0xfa   :  { %769 = vmatmul.mubr.f32.gmra.mxu1 %v230_v35 }
 0x18a   :  { %v320_v39 = vpop.f32.mrf.mxu1 }
 0x18b   :  { %v321_v40 = vadd.f32 %v1155_v38, %v320_v39 }
 0x18c   :  { %v734_v41 = vpop.f32.mrf.mxu1 }
 0x18d   :  { %v384_v42 = vmax.f32 %v321_v40, 0.0 }
 0x18e   :  { %v325_v43 = vpop.f32.mrf.mxu1 }
 0x18f   :  { %v326_v44 = vadd.f32 %v1155_v38, %v325_v43  ;;  %804 = vmatmul.mubr.f32.vlgmr.msra.gmra.mxu0 %v384_v42 }
 0x190   :  { %v737_v45 = vpop.f32.mrf.mxu1  ;;  %806 = vmatprep.mubr.msk.f32.mxu0 %vm849_vm0, %v848_v0 }
 0x191   :  { %v385_v46 = vmax.f32 %v326_v44, 0.0 }
 0x192   :  { %v330_v47 = vpop.f32.mrf.mxu1 }
 0x193   :  { %v331_v48 = vadd.f32 %v1155_v38, %v330_v47  ;;  %807 = vmatmul.mubr.f32.gmra.mxu0 %v385_v46 }
 0x194   :  { %v740_v49 = vpop.f32.mrf.mxu1  ;;  %809 = vmatprep.mubr.msk.f32.mxu0 %vm849_vm0, %v848_v0 }
 0x195   :  { %v386_v50 = vmax.f32 %v331_v48, 0.0 }
 0x196   :  { %v335_v51 = vpop.f32.mrf.mxu1 }
 0x197   :  { %v336_v52 = vadd.f32 %v1155_v38, %v335_v51  ;;  %810 = vmatmul.mubr.f32.gmra.mxu0 %v386_v50 }
 0x198   :  { %v743_v53 = vpop.f32.mrf.mxu1  ;;  %812 = vmatprep.mubr.msk.f32.mxu0 %vm849_vm0, %v848_v0 }
 0x199   :  { %v387_v54 = vmax.f32 %v336_v52, 0.0 }
 0x19a   :  { %v340_v55 = vpop.f32.mrf.mxu1 }
 0x19b   :  { %v341_v56 = vadd.f32 %v1155_v38, %v340_v55  ;;  %813 = vmatmul.mubr.f32.gmra.mxu0 %v387_v54 }
 0x19c   :  { %v746_v57 = vpop.f32.mrf.mxu1  ;;  %815 = vmatprep.mubr.msk.f32.mxu0 %vm849_vm0, %v848_v0 }
 0x19d   :  { %v388_v58 = vmax.f32 %v341_v56, 0.0 }
 0x19e   :  { %v345_v59 = vpop.f32.mrf.mxu1 }
 0x19f   :  { %v346_v60 = vadd.f32 %v1155_v38, %v345_v59  ;;  %816 = vmatmul.mubr.f32.gmra.mxu0 %v388_v58 }
 0x1a0   :  { %v749_v61 = vpop.f32.mrf.mxu1  ;;  %818 = vmatprep.mubr.msk.f32.mxu0 %vm849_vm0, %v848_v0 }
 0x1a1   :  { %v389_v62 = vmax.f32 %v346_v60, 0.0 }
 0x1a2   :  { %v350_v63 = vpop.f32.mrf.mxu1 }
 0x1a3   :  { %v351_v1 = vadd.f32 %v1155_v38, %v350_v63  ;;  %819 = vmatmul.mubr.f32.gmra.mxu0 %v389_v62 }
 0x1a4   :  { %v752_v2 = vpop.f32.mrf.mxu1  ;;  %821 = vmatprep.mubr.msk.f32.mxu0 %vm849_vm0, %v848_v0 }
 0x1a5   :  { %v390_v3 = vmax.f32 %v351_v1, 0.0 }
 0x1a6   :  { %v355_v4 = vpop.f32.mrf.mxu1 }
 0x1a7   :  { %v356_v5 = vadd.f32 %v1155_v38, %v355_v4  ;;  %822 = vmatmul.mubr.f32.gmra.mxu0 %v390_v3 }
 0x1a8   :  { %v755_v6 = vpop.f32.mrf.mxu1  ;;  %824 = vmatprep.mubr.msk.f32.mxu0 %vm849_vm0, %v848_v0 }
 0x1a9   :  { %v391_v7 = vmax.f32 %v356_v5, 0.0 }
 0x1aa   :  { %v360_v8 = vpop.f32.mrf.mxu1 }
 0x1ab   :  { %v361_v9 = vadd.f32 %v1155_v38, %v360_v8  ;;  %825 = vmatmul.mubr.f32.gmra.mxu0 %v391_v7 }
 0x1ac   :  { %v758_v10 = vpop.f32.mrf.mxu1  ;;  %827 = vmatprep.mubr.msk.f32.mxu0 %vm849_vm0, %v848_v0 }
 0x1ad   :  { %v392_v11 = vmax.f32 %v361_v9, 0.0 }
 0x1ae   :  { %v365_v12 = vpop.f32.mrf.mxu1 }
 0x1af   :  { %v366_v13 = vadd.f32 %v1155_v38, %v365_v12  ;;  %828 = vmatmul.mubr.f32.gmra.mxu0 %v392_v11 }
 0x1b0   :  { %v761_v14 = vpop.f32.mrf.mxu1  ;;  %830 = vmatprep.mubr.msk.f32.mxu0 %vm849_vm0, %v848_v0 }
 0x1b1   :  { %v393_v15 = vmax.f32 %v366_v13, 0.0 }
 0x1b2   :  { %v370_v16 = vpop.f32.mrf.mxu1 }
 0x1b3   :  { %v371_v17 = vadd.f32 %v1155_v38, %v370_v16  ;;  %831 = vmatmul.mubr.f32.gmra.mxu0 %v393_v15 }
 0x1b4   :  { %v764_v18 = vpop.f32.mrf.mxu1  ;;  %833 = vmatprep.mubr.msk.f32.mxu0 %vm849_vm0, %v848_v0 }
 0x1b5   :  { %v394_v19 = vmax.f32 %v371_v17, 0.0 }
 0x1b6   :  { %v375_v20 = vpop.f32.mrf.mxu1 }
 0x1b7   :  { %v376_v21 = vadd.f32 %v1155_v38, %v375_v20  ;;  %834 = vmatmul.mubr.f32.gmra.mxu0 %v394_v19 }
 0x1b8   :  { %v767_v22 = vpop.f32.mrf.mxu1  ;;  %836 = vmatprep.mubr.msk.f32.mxu0 %vm849_vm0, %v848_v0 }
 0x1b9   :  { %v395_v23 = vmax.f32 %v376_v21, 0.0 }
 0x1ba   :  { %v380_v24 = vpop.f32.mrf.mxu1 }
 0x1bb   :  { %v381_v25 = vadd.f32 %v1155_v38, %v380_v24  ;;  %837 = vmatmul.mubr.f32.gmra.mxu0 %v395_v23 }
 0x1bc   :  { %v770_v26 = vpop.f32.mrf.mxu1  ;;  %839 = vmatprep.mubr.msk.f32.mxu0 %vm849_vm0, %v848_v0 }
 0x1bd   :  { %v396_v27 = vmax.f32 %v381_v25, 0.0 }
 0x1bf   :  { %840 = vmatmul.mubr.f32.gmra.mxu0 %v396_v27 }
 0x24f   :  { %v486_v29 = vpop.f32.mrf.mxu0 }
 0x250   :  { %v487_v30 = vadd.f32 %v583_v28, %v486_v29 }
 0x251   :  { %v805_v31 = vpop.f32.mrf.mxu0 }
 0x252   :  { %551 = vst.msk [vmem:[%s1256_s7] sm:$0xff] %vm550_vm2, %v487_v30 }
 0x253   :  { %v491_v32 = vpop.f32.mrf.mxu0 }
 0x254   :  { %v492_v33 = vadd.f32 %v583_v28, %v491_v32 }
 0x255   :  { %v808_v34 = vpop.f32.mrf.mxu0 }
 0x256   :  { %552 = vst.msk [vmem:[%s1256_s7 + $0x8] sm:$0xff] %vm550_vm2, %v492_v33 }
 0x257   :  { %v496_v0 = vpop.f32.mrf.mxu0 }
 0x258   :  { %v497_v35 = vadd.f32 %v583_v28, %v496_v0 }
 0x259   :  { %v811_v36 = vpop.f32.mrf.mxu0 }
 0x25a   :  { %553 = vst.msk [vmem:[%s1256_s7 + $0x10] sm:$0xff] %vm550_vm2, %v497_v35 }
 0x25b   :  { %v501_v37 = vpop.f32.mrf.mxu0 }
 0x25c   :  { %v502_v38 = vadd.f32 %v583_v28, %v501_v37 }
 0x25d   :  { %v814_v39 = vpop.f32.mrf.mxu0 }
 0x25e   :  { %554 = vst.msk [vmem:[%s1256_s7 + $0x18] sm:$0xff] %vm550_vm2, %v502_v38 }
 0x25f   :  { %v506_v40 = vpop.f32.mrf.mxu0 }
 0x260   :  { %v507_v41 = vadd.f32 %v583_v28, %v506_v40 }
 0x261   :  { %v817_v42 = vpop.f32.mrf.mxu0 }
 0x262   :  { %555 = vst.msk [vmem:[%s1256_s7 + $0x20] sm:$0xff] %vm550_vm2, %v507_v41 }
 0x263   :  { %v511_v43 = vpop.f32.mrf.mxu0 }
 0x264   :  { %v512_v44 = vadd.f32 %v583_v28, %v511_v43 }
 0x265   :  { %v820_v45 = vpop.f32.mrf.mxu0 }
 0x266   :  { %556 = vst.msk [vmem:[%s1256_s7 + $0x28] sm:$0xff] %vm550_vm2, %v512_v44 }
 0x267   :  { %v516_v46 = vpop.f32.mrf.mxu0 }
 0x268   :  { %v517_v47 = vadd.f32 %v583_v28, %v516_v46 }
 0x269   :  { %v823_v48 = vpop.f32.mrf.mxu0 }
 0x26a   :  { %557 = vst.msk [vmem:[%s1256_s7 + $0x30] sm:$0xff] %vm550_vm2, %v517_v47 }
 0x26b   :  { %v521_v49 = vpop.f32.mrf.mxu0 }
 0x26c   :  { %v522_v50 = vadd.f32 %v583_v28, %v521_v49 }
 0x26d   :  { %v826_v51 = vpop.f32.mrf.mxu0 }
 0x26e   :  { %558 = vst.msk [vmem:[%s1256_s7 + $0x38] sm:$0xff] %vm550_vm2, %v522_v50 }
 0x26f   :  { %v526_v52 = vpop.f32.mrf.mxu0 }
 0x270   :  { %v527_v53 = vadd.f32 %v583_v28, %v526_v52 }
 0x271   :  { %v829_v54 = vpop.f32.mrf.mxu0 }
 0x272   :  { %559 = vst.msk [vmem:[%s1256_s7 + $0x40] sm:$0xff] %vm550_vm2, %v527_v53 }
 0x273   :  { %v531_v55 = vpop.f32.mrf.mxu0 }
 0x274   :  { %v532_v56 = vadd.f32 %v583_v28, %v531_v55 }
 0x275   :  { %v832_v57 = vpop.f32.mrf.mxu0 }
 0x276   :  { %560 = vst.msk [vmem:[%s1256_s7 + $0x48] sm:$0xff] %vm550_vm2, %v532_v56 }
 0x277   :  { %v536_v58 = vpop.f32.mrf.mxu0 }
 0x278   :  { %v537_v59 = vadd.f32 %v583_v28, %v536_v58 }
 0x279   :  { %v835_v60 = vpop.f32.mrf.mxu0 }
 0x27a   :  { %561 = vst.msk [vmem:[%s1256_s7 + $0x50] sm:$0xff] %vm550_vm2, %v537_v59 }
 0x27b   :  { %v541_v61 = vpop.f32.mrf.mxu0 }
 0x27c   :  { %v542_v62 = vadd.f32 %v583_v28, %v541_v61 }
 0x27d   :  { %v838_v63 = vpop.f32.mrf.mxu0 }
 0x27e   :  { %562 = vst.msk [vmem:[%s1256_s7 + $0x58] sm:$0xff] %vm550_vm2, %v542_v62 }
 0x27f   :  { %v546_v1 = vpop.f32.mrf.mxu0 }
 0x280   :  { %v547_v2 = vadd.f32 %v583_v28, %v546_v1 }
 0x281   :  { %v841_v3 = vpop.f32.mrf.mxu0 }
 0x282   :  { %563 = vst.msk [vmem:[%s1256_s7 + $0x60] sm:$0xff] %vm550_vm2, %v547_v2 }

</bundles_post_ra>
